<compile_context>
chip_gen: v7x
topology: tpu7x:2x2x1
jax: 0.10.0
libtpu: 0.0.40
codegen_flags: <defaults>
</compile_context>

<pallas_src>
import math

import jax
import jax.numpy as jnp
from jax.experimental import pallas as pl
from jax.experimental.pallas import tpu as pltpu


def _conv_stride2_kernel(e_ref, o_ref, w_ref, b_ref, out_ref):
    # e_ref / o_ref : (1, M, Cin)    even / odd rows of the zero-padded NLC input
    # w_ref         : (K, Cin, Cout) weights, tap-major
    # b_ref         : (1, Cout)      bias (f32)
    # out_ref       : (1, Lout, Cout)
    lout = out_ref.shape[1]
    cout = out_ref.shape[2]
    cin = e_ref.shape[2]

    # Tap k of the stride-2 conv reads padded row 2*t + k:
    #   k=0 -> e[t], k=1 -> o[t], k=2 -> e[t+1], k=3 -> o[t+1], k=4 -> e[t+2]
    taps = ((e_ref, 0), (o_ref, 0), (e_ref, 1), (o_ref, 1), (e_ref, 2))

    acc = jnp.zeros((lout, cout), jnp.float32)
    for k, (src_ref, off) in enumerate(taps):
        xs = src_ref[0, pl.ds(off, lout), :]          # (Lout, Cin), contiguous slice
        wk = w_ref[k]                                  # (Cin, Cout)
        if cin == 1:
            # Contraction of size 1: keep it on the VPU (broadcast MAC), not the MXU.
            acc = acc + xs.astype(jnp.float32) * wk.astype(jnp.float32)
        else:
            acc = acc + jnp.dot(xs, wk, preferred_element_type=jnp.float32)

    acc = acc + b_ref[...].astype(jnp.float32)
    out_ref[0] = acc.astype(out_ref.dtype)


def conv1d_stride2_pallas(x_nlc, w, b, *, out_dtype):
    """One ConvNorm layer (Conv1d, k=5, stride=2, pad=2) on NLC activations."""
    B, L, Cin = x_nlc.shape
    Cout, Cin_w, K = w.shape
    assert Cin_w == Cin and K == 5
    stride, pad = 2, 2
    Lout = (L + 2 * pad - K) // stride + 1
    M = Lout + 2                      # even/odd rows each (includes the conv halo)

    # Layer 1 (Cin=1) stays f32 on the VPU; the MXU layers use bf16 inputs.
    mxu = Cin > 1
    act_dtype = jnp.bfloat16 if mxu else jnp.float32

    # Zero-pad the length axis so the padded length is exactly 2*M, then split into
    # even/odd row phases (pure XLA indexing, 1x HBM traffic — no im2col blow-up).
    right = 2 * M - pad - L
    xp = jnp.pad(x_nlc.astype(act_dtype), ((0, 0), (pad, right), (0, 0)))
    xr = xp.reshape(B, M, 2, Cin)
    e = xr[:, :, 0, :]                                   # (B, M, Cin)
    o = xr[:, :, 1, :]                                   # (B, M, Cin)

    wk = jnp.transpose(w, (2, 1, 0)).astype(act_dtype)   # (K, Cin, Cout)
    b2 = b.reshape(1, Cout).astype(jnp.float32)

    flops = 2 * B * Lout * Cin * K * Cout
    bytes_accessed = (
        2 * e.size * jnp.dtype(act_dtype).itemsize       # e + o
        + wk.size * jnp.dtype(act_dtype).itemsize
        + b2.size * 4
        + B * Lout * Cout * jnp.dtype(out_dtype).itemsize
    )

    return pl.pallas_call(
        _conv_stride2_kernel,
        out_shape=jax.ShapeDtypeStruct((B, Lout, Cout), out_dtype),
        grid=(B,),
        in_specs=[
            pl.BlockSpec((1, M, Cin), lambda i: (i, 0, 0)),
            pl.BlockSpec((1, M, Cin), lambda i: (i, 0, 0)),
            pl.BlockSpec((K, Cin, Cout), lambda i: (0, 0, 0)),
            pl.BlockSpec((1, Cout), lambda i: (0, 0)),
        ],
        out_specs=pl.BlockSpec((1, Lout, Cout), lambda i: (i, 0, 0)),
        compiler_params=pltpu.CompilerParams(dimension_semantics=("parallel",)),
        cost_estimate=pl.CostEstimate(
            flops=flops, transcendentals=0, bytes_accessed=bytes_accessed),
    )(e, o, wk, b2)


def init_encoder_params(key, channel=(1, 64, 128, 256), kernel_size=5, stage=3):
    """Xavier-uniform conv weights (gain('linear')=1.0) + PyTorch-default conv bias."""
    params = []
    for i in range(stage):
        key, kw, kb = jax.random.split(key, 3)
        cin, cout = channel[i], channel[i + 1]
        fan_in = cin * kernel_size
        fan_out = cout * kernel_size
        bound = math.sqrt(6.0 / (fan_in + fan_out))
        w = jax.random.uniform(kw, (cout, cin, kernel_size), jnp.float32, -bound, bound)
        bbound = 1.0 / math.sqrt(fan_in)
        b = jax.random.uniform(kb, (cout,), jnp.float32, -bbound, bbound)
        params.append((w, b))
    return params


def encoder_forward(params, x):
    """Mirrors Encoder.forward: x is NCL (B, C0, L); returns NCL (B, C_last, L_out) f32."""
    h = jnp.transpose(x, (0, 2, 1))                      # NCL -> NLC (done once)
    n = len(params)
    for i, (w, b) in enumerate(params):
        out_dtype = jnp.float32 if i == n - 1 else jnp.bfloat16
        h = conv1d_stride2_pallas(h, w, b, out_dtype=out_dtype)
    return jnp.transpose(h, (0, 2, 1))                   # NLC -> NCL


def encoder_reference(params, x):
    """Pure-JAX reference with the same per-layer precision (bf16 MXU, f32 accumulate)."""
    h = x
    n = len(params)
    for i, (w, b) in enumerate(params):
        cin = w.shape[1]
        cd = jnp.float32 if cin == 1 else jnp.bfloat16
        y = jax.lax.conv_general_dilated(
            h.astype(cd), w.astype(cd),
            window_strides=(2,), padding=[(2, 2)],
            dimension_numbers=("NCH", "OIH", "NCH"),
            preferred_element_type=jnp.float32)
        y = y + b.astype(jnp.float32)[None, :, None]
        h = y.astype(jnp.float32 if i == n - 1 else jnp.bfloat16)
    return h


if __name__ == "__main__":
    key = jax.random.PRNGKey(0)
    k_params, k_x = jax.random.split(key)

    # Small shapes consistent with the module: batch=2, in_channels=1, length=16.
    B, L = 2, 16
    x = jax.random.normal(k_x, (B, 1, L), dtype=jnp.float32)
    params = init_encoder_params(k_params)

    fwd = jax.jit(encoder_forward)
    out = jax.block_until_ready(fwd(params, x))

    ref = jax.block_until_ready(encoder_reference(params, x))
    assert out.shape == (B, 256, 2), out.shape
    assert out.dtype == jnp.float32, out.dtype
    max_err = float(jnp.max(jnp.abs(out - ref)))
    assert jnp.allclose(out, ref, atol=2e-2, rtol=2e-2), max_err

    print("KERNEL_OK")
</pallas_src>

<mosaic_0001>
module attributes {stable_mosaic.version = 11 : i64} {
  func.func @_conv_stride2_kernel(%arg0: i32, %arg1: memref<1x10x1xf32, #tpu.memory_space<vmem>>, %arg2: memref<1x10x1xf32, #tpu.memory_space<vmem>>, %arg3: memref<5x1x64xf32, #tpu.memory_space<vmem>>, %arg4: memref<1x64xf32, #tpu.memory_space<vmem>>, %arg5: memref<1x8x64xbf16, #tpu.memory_space<vmem>>) attributes {dimension_semantics = [#tpu.dimension_semantics<parallel>], iteration_bounds = array<i64: 2>, scalar_prefetch = 0 : i64, scratch_operands = 0 : i64, tpu.core_type = #tpu.core_type<tc>, window_params = [{transform_indices = @transform_0, window_bounds = array<i64: 1, 10, 1>}, {transform_indices = @transform_1, window_bounds = array<i64: 1, 10, 1>}, {pipeline_mode = #tpu.pipeline_mode<synchronous>, transform_indices = @transform_2, window_bounds = array<i64: 5, 1, 64>}, {pipeline_mode = #tpu.pipeline_mode<synchronous>, transform_indices = @transform_3, window_bounds = array<i64: 1, 64>}, {transform_indices = @transform_4, window_bounds = array<i64: 1, 8, 64>}]} {
    %cst = arith.constant 0.000000e+00 : f32
    %0 = vector.broadcast %cst : f32 to vector<8x64xf32>
    %c0 = arith.constant 0 : index
    %c0_0 = arith.constant 0 : index
    %c0_1 = arith.constant 0 : index
    %1 = vector.load %arg1[%c0, %c0_0, %c0_1] : memref<1x10x1xf32, #tpu.memory_space<vmem>>, vector<1x8x1xf32>
    %2 = vector.shape_cast %1 : vector<1x8x1xf32> to vector<8x1xf32>
    %c0_2 = arith.constant 0 : index
    %c0_3 = arith.constant 0 : index
    %c0_4 = arith.constant 0 : index
    %3 = vector.load %arg3[%c0_2, %c0_3, %c0_4] : memref<5x1x64xf32, #tpu.memory_space<vmem>>, vector<1x1x64xf32>
    %4 = vector.shape_cast %3 : vector<1x1x64xf32> to vector<1x64xf32>
    %5 = vector.broadcast %2 : vector<8x1xf32> to vector<8x64xf32>
    %6 = vector.broadcast %4 : vector<1x64xf32> to vector<8x64xf32>
    %7 = arith.mulf %5, %6 : vector<8x64xf32>
    %8 = arith.addf %0, %7 : vector<8x64xf32>
    %c0_5 = arith.constant 0 : index
    %c0_6 = arith.constant 0 : index
    %c0_7 = arith.constant 0 : index
    %9 = vector.load %arg2[%c0_5, %c0_6, %c0_7] : memref<1x10x1xf32, #tpu.memory_space<vmem>>, vector<1x8x1xf32>
    %10 = vector.shape_cast %9 : vector<1x8x1xf32> to vector<8x1xf32>
    %c1 = arith.constant 1 : index
    %c0_8 = arith.constant 0 : index
    %c0_9 = arith.constant 0 : index
    %11 = vector.load %arg3[%c1, %c0_8, %c0_9] : memref<5x1x64xf32, #tpu.memory_space<vmem>>, vector<1x1x64xf32>
    %12 = vector.shape_cast %11 : vector<1x1x64xf32> to vector<1x64xf32>
    %13 = vector.broadcast %10 : vector<8x1xf32> to vector<8x64xf32>
    %14 = vector.broadcast %12 : vector<1x64xf32> to vector<8x64xf32>
    %15 = arith.mulf %13, %14 : vector<8x64xf32>
    %16 = arith.addf %8, %15 : vector<8x64xf32>
    %c0_10 = arith.constant 0 : index
    %c1_11 = arith.constant 1 : index
    %c0_12 = arith.constant 0 : index
    %17 = vector.load %arg1[%c0_10, %c1_11, %c0_12] : memref<1x10x1xf32, #tpu.memory_space<vmem>>, vector<1x8x1xf32>
    %18 = vector.shape_cast %17 : vector<1x8x1xf32> to vector<8x1xf32>
    %c2 = arith.constant 2 : index
    %c0_13 = arith.constant 0 : index
    %c0_14 = arith.constant 0 : index
    %19 = vector.load %arg3[%c2, %c0_13, %c0_14] : memref<5x1x64xf32, #tpu.memory_space<vmem>>, vector<1x1x64xf32>
    %20 = vector.shape_cast %19 : vector<1x1x64xf32> to vector<1x64xf32>
    %21 = vector.broadcast %18 : vector<8x1xf32> to vector<8x64xf32>
    %22 = vector.broadcast %20 : vector<1x64xf32> to vector<8x64xf32>
    %23 = arith.mulf %21, %22 : vector<8x64xf32>
    %24 = arith.addf %16, %23 : vector<8x64xf32>
    %c0_15 = arith.constant 0 : index
    %c1_16 = arith.constant 1 : index
    %c0_17 = arith.constant 0 : index
    %25 = vector.load %arg2[%c0_15, %c1_16, %c0_17] : memref<1x10x1xf32, #tpu.memory_space<vmem>>, vector<1x8x1xf32>
    %26 = vector.shape_cast %25 : vector<1x8x1xf32> to vector<8x1xf32>
    %c3 = arith.constant 3 : index
    %c0_18 = arith.constant 0 : index
    %c0_19 = arith.constant 0 : index
    %27 = vector.load %arg3[%c3, %c0_18, %c0_19] : memref<5x1x64xf32, #tpu.memory_space<vmem>>, vector<1x1x64xf32>
    %28 = vector.shape_cast %27 : vector<1x1x64xf32> to vector<1x64xf32>
    %29 = vector.broadcast %26 : vector<8x1xf32> to vector<8x64xf32>
    %30 = vector.broadcast %28 : vector<1x64xf32> to vector<8x64xf32>
    %31 = arith.mulf %29, %30 : vector<8x64xf32>
    %32 = arith.addf %24, %31 : vector<8x64xf32>
    %c0_20 = arith.constant 0 : index
    %c2_21 = arith.constant 2 : index
    %c0_22 = arith.constant 0 : index
    %33 = vector.load %arg1[%c0_20, %c2_21, %c0_22] : memref<1x10x1xf32, #tpu.memory_space<vmem>>, vector<1x8x1xf32>
    %34 = vector.shape_cast %33 : vector<1x8x1xf32> to vector<8x1xf32>
    %c4 = arith.constant 4 : index
    %c0_23 = arith.constant 0 : index
    %c0_24 = arith.constant 0 : index
    %35 = vector.load %arg3[%c4, %c0_23, %c0_24] : memref<5x1x64xf32, #tpu.memory_space<vmem>>, vector<1x1x64xf32>
    %36 = vector.shape_cast %35 : vector<1x1x64xf32> to vector<1x64xf32>
    %37 = vector.broadcast %34 : vector<8x1xf32> to vector<8x64xf32>
    %38 = vector.broadcast %36 : vector<1x64xf32> to vector<8x64xf32>
    %39 = arith.mulf %37, %38 : vector<8x64xf32>
    %40 = arith.addf %32, %39 : vector<8x64xf32>
    %c0_25 = arith.constant 0 : index
    %c0_26 = arith.constant 0 : index
    %41 = vector.load %arg4[%c0_25, %c0_26] : memref<1x64xf32, #tpu.memory_space<vmem>>, vector<1x64xf32>
    %42 = vector.broadcast %41 : vector<1x64xf32> to vector<8x64xf32>
    %43 = arith.addf %40, %42 : vector<8x64xf32>
    %44 = arith.truncf %43 : vector<8x64xf32> to vector<8x64xbf16>
    %c0_27 = arith.constant 0 : index
    %c0_28 = arith.constant 0 : index
    %c0_29 = arith.constant 0 : index
    %45 = vector.load %arg5[%c0_27, %c0_28, %c0_29] : memref<1x8x64xbf16, #tpu.memory_space<vmem>>, vector<1x8x64xbf16>
    %46 = vector.shape_cast %45 : vector<1x8x64xbf16> to vector<8x64xbf16>
    %47 = vector.shape_cast %44 : vector<8x64xbf16> to vector<1x8x64xbf16>
    tpu.vector_store %arg5[%c0_27, %c0_28, %c0_29], %47 {strides = array<i32>} : memref<1x8x64xbf16, #tpu.memory_space<vmem>>, vector<1x8x64xbf16>,
    return
  }
  func.func @transform_0(%arg0: i32) -> (i32, i32, i32) {
    %c0_i32 = arith.constant 0 : i32
    %c0_i32_0 = arith.constant 0 : i32
    %c0_i32_1 = arith.constant 0 : i32
    return %arg0, %c0_i32, %c0_i32_0 : i32, i32, i32
  }
  func.func @transform_1(%arg0: i32) -> (i32, i32, i32) {
    %c0_i32 = arith.constant 0 : i32
    %c0_i32_0 = arith.constant 0 : i32
    %c0_i32_1 = arith.constant 0 : i32
    return %arg0, %c0_i32, %c0_i32_0 : i32, i32, i32
  }
  func.func @transform_2(%arg0: i32) -> (i32, i32, i32) {
    %c0_i32 = arith.constant 0 : i32
    %c0_i32_0 = arith.constant 0 : i32
    %c0_i32_1 = arith.constant 0 : i32
    %c0_i32_2 = arith.constant 0 : i32
    return %c0_i32, %c0_i32_0, %c0_i32_1 : i32, i32, i32
  }
  func.func @transform_3(%arg0: i32) -> (i32, i32) {
    %c0_i32 = arith.constant 0 : i32
    %c0_i32_0 = arith.constant 0 : i32
    %c0_i32_1 = arith.constant 0 : i32
    return %c0_i32, %c0_i32_0 : i32, i32
  }
  func.func @transform_4(%arg0: i32) -> (i32, i32, i32) {
    %c0_i32 = arith.constant 0 : i32
    %c0_i32_0 = arith.constant 0 : i32
    %c0_i32_1 = arith.constant 0 : i32
    return %arg0, %c0_i32, %c0_i32_0 : i32, i32, i32
  }
}

module attributes {stable_mosaic.version = 11 : i64} {
  func.func @_conv_stride2_kernel(%arg0: i32, %arg1: memref<1x6x64xbf16, #tpu.memory_space<vmem>>, %arg2: memref<1x6x64xbf16, #tpu.memory_space<vmem>>, %arg3: memref<5x64x128xbf16, #tpu.memory_space<vmem>>, %arg4: memref<1x128xf32, #tpu.memory_space<vmem>>, %arg5: memref<1x4x128xbf16, #tpu.memory_space<vmem>>) attributes {dimension_semantics = [#tpu.dimension_semantics<parallel>], iteration_bounds = array<i64: 2>, scalar_prefetch = 0 : i64, scratch_operands = 0 : i64, tpu.core_type = #tpu.core_type<tc>, window_params = [{transform_indices = @transform_0, window_bounds = array<i64: 1, 6, 64>}, {transform_indices = @transform_1, window_bounds = array<i64: 1, 6, 64>}, {pipeline_mode = #tpu.pipeline_mode<synchronous>, transform_indices = @transform_2, window_bounds = array<i64: 5, 64, 128>}, {pipeline_mode = #tpu.pipeline_mode<synchronous>, transform_indices = @transform_3, window_bounds = array<i64: 1, 128>}, {transform_indices = @transform_4, window_bounds = array<i64: 1, 4, 128>}]} {
    %cst = arith.constant 0.000000e+00 : f32
    %0 = vector.broadcast %cst : f32 to vector<4x128xf32>
    %c0 = arith.constant 0 : index
    %c0_0 = arith.constant 0 : index
    %c0_1 = arith.constant 0 : index
    %1 = vector.load %arg1[%c0, %c0_0, %c0_1] : memref<1x6x64xbf16, #tpu.memory_space<vmem>>, vector<1x4x64xbf16>
    %2 = vector.shape_cast %1 : vector<1x4x64xbf16> to vector<4x64xbf16>
    %c0_2 = arith.constant 0 : index
    %c0_3 = arith.constant 0 : index
    %c0_4 = arith.constant 0 : index
    %3 = vector.load %arg3[%c0_2, %c0_3, %c0_4] : memref<5x64x128xbf16, #tpu.memory_space<vmem>>, vector<1x64x128xbf16>
    %4 = vector.shape_cast %3 : vector<1x64x128xbf16> to vector<64x128xbf16>
    %cst_5 = arith.constant dense<0.000000e+00> : vector<4x128xf32>
    %5 = tpu.matmul %2, %4, %cst_5 {dimension_numbers = #tpu.dot_dimension_numbers<[1], [0], [0], [1], [0, 0, 1, 1], [], []>} : vector<4x64xbf16>, vector<64x128xbf16>, vector<4x128xf32> -> vector<4x128xf32>
    %6 = arith.addf %0, %5 : vector<4x128xf32>
    %c0_6 = arith.constant 0 : index
    %c0_7 = arith.constant 0 : index
    %c0_8 = arith.constant 0 : index
    %7 = vector.load %arg2[%c0_6, %c0_7, %c0_8] : memref<1x6x64xbf16, #tpu.memory_space<vmem>>, vector<1x4x64xbf16>
    %8 = vector.shape_cast %7 : vector<1x4x64xbf16> to vector<4x64xbf16>
    %c1 = arith.constant 1 : index
    %c0_9 = arith.constant 0 : index
    %c0_10 = arith.constant 0 : index
    %9 = vector.load %arg3[%c1, %c0_9, %c0_10] : memref<5x64x128xbf16, #tpu.memory_space<vmem>>, vector<1x64x128xbf16>
    %10 = vector.shape_cast %9 : vector<1x64x128xbf16> to vector<64x128xbf16>
    %cst_11 = arith.constant dense<0.000000e+00> : vector<4x128xf32>
    %11 = tpu.matmul %8, %10, %cst_11 {dimension_numbers = #tpu.dot_dimension_numbers<[1], [0], [0], [1], [0, 0, 1, 1], [], []>} : vector<4x64xbf16>, vector<64x128xbf16>, vector<4x128xf32> -> vector<4x128xf32>
    %12 = arith.addf %6, %11 : vector<4x128xf32>
    %c0_12 = arith.constant 0 : index
    %c1_13 = arith.constant 1 : index
    %c0_14 = arith.constant 0 : index
    %13 = vector.load %arg1[%c0_12, %c1_13, %c0_14] : memref<1x6x64xbf16, #tpu.memory_space<vmem>>, vector<1x4x64xbf16>
    %14 = vector.shape_cast %13 : vector<1x4x64xbf16> to vector<4x64xbf16>
    %c2 = arith.constant 2 : index
    %c0_15 = arith.constant 0 : index
    %c0_16 = arith.constant 0 : index
    %15 = vector.load %arg3[%c2, %c0_15, %c0_16] : memref<5x64x128xbf16, #tpu.memory_space<vmem>>, vector<1x64x128xbf16>
    %16 = vector.shape_cast %15 : vector<1x64x128xbf16> to vector<64x128xbf16>
    %cst_17 = arith.constant dense<0.000000e+00> : vector<4x128xf32>
    %17 = tpu.matmul %14, %16, %cst_17 {dimension_numbers = #tpu.dot_dimension_numbers<[1], [0], [0], [1], [0, 0, 1, 1], [], []>} : vector<4x64xbf16>, vector<64x128xbf16>, vector<4x128xf32> -> vector<4x128xf32>
    %18 = arith.addf %12, %17 : vector<4x128xf32>
    %c0_18 = arith.constant 0 : index
    %c1_19 = arith.constant 1 : index
    %c0_20 = arith.constant 0 : index
    %19 = vector.load %arg2[%c0_18, %c1_19, %c0_20] : memref<1x6x64xbf16, #tpu.memory_space<vmem>>, vector<1x4x64xbf16>
    %20 = vector.shape_cast %19 : vector<1x4x64xbf16> to vector<4x64xbf16>
    %c3 = arith.constant 3 : index
    %c0_21 = arith.constant 0 : index
    %c0_22 = arith.constant 0 : index
    %21 = vector.load %arg3[%c3, %c0_21, %c0_22] : memref<5x64x128xbf16, #tpu.memory_space<vmem>>, vector<1x64x128xbf16>
    %22 = vector.shape_cast %21 : vector<1x64x128xbf16> to vector<64x128xbf16>
    %cst_23 = arith.constant dense<0.000000e+00> : vector<4x128xf32>
    %23 = tpu.matmul %20, %22, %cst_23 {dimension_numbers = #tpu.dot_dimension_numbers<[1], [0], [0], [1], [0, 0, 1, 1], [], []>} : vector<4x64xbf16>, vector<64x128xbf16>, vector<4x128xf32> -> vector<4x128xf32>
    %24 = arith.addf %18, %23 : vector<4x128xf32>
    %c0_24 = arith.constant 0 : index
    %c2_25 = arith.constant 2 : index
    %c0_26 = arith.constant 0 : index
    %25 = vector.load %arg1[%c0_24, %c2_25, %c0_26] : memref<1x6x64xbf16, #tpu.memory_space<vmem>>, vector<1x4x64xbf16>
    %26 = vector.shape_cast %25 : vector<1x4x64xbf16> to vector<4x64xbf16>
    %c4 = arith.constant 4 : index
    %c0_27 = arith.constant 0 : index
    %c0_28 = arith.constant 0 : index
    %27 = vector.load %arg3[%c4, %c0_27, %c0_28] : memref<5x64x128xbf16, #tpu.memory_space<vmem>>, vector<1x64x128xbf16>
    %28 = vector.shape_cast %27 : vector<1x64x128xbf16> to vector<64x128xbf16>
    %cst_29 = arith.constant dense<0.000000e+00> : vector<4x128xf32>
    %29 = tpu.matmul %26, %28, %cst_29 {dimension_numbers = #tpu.dot_dimension_numbers<[1], [0], [0], [1], [0, 0, 1, 1], [], []>} : vector<4x64xbf16>, vector<64x128xbf16>, vector<4x128xf32> -> vector<4x128xf32>
    %30 = arith.addf %24, %29 : vector<4x128xf32>
    %c0_30 = arith.constant 0 : index
    %c0_31 = arith.constant 0 : index
    %31 = vector.load %arg4[%c0_30, %c0_31] : memref<1x128xf32, #tpu.memory_space<vmem>>, vector<1x128xf32>
    %32 = vector.broadcast %31 : vector<1x128xf32> to vector<4x128xf32>
    %33 = arith.addf %30, %32 : vector<4x128xf32>
    %34 = arith.truncf %33 : vector<4x128xf32> to vector<4x128xbf16>
    %c0_32 = arith.constant 0 : index
    %c0_33 = arith.constant 0 : index
    %c0_34 = arith.constant 0 : index
    %35 = vector.load %arg5[%c0_32, %c0_33, %c0_34] : memref<1x4x128xbf16, #tpu.memory_space<vmem>>, vector<1x4x128xbf16>
    %36 = vector.shape_cast %35 : vector<1x4x128xbf16> to vector<4x128xbf16>
    %37 = vector.shape_cast %34 : vector<4x128xbf16> to vector<1x4x128xbf16>
    tpu.vector_store %arg5[%c0_32, %c0_33, %c0_34], %37 {strides = array<i32>} : memref<1x4x128xbf16, #tpu.memory_space<vmem>>, vector<1x4x128xbf16>,
    return
  }
  func.func @transform_0(%arg0: i32) -> (i32, i32, i32) {
    %c0_i32 = arith.constant 0 : i32
    %c0_i32_0 = arith.constant 0 : i32
    %c0_i32_1 = arith.constant 0 : i32
    return %arg0, %c0_i32, %c0_i32_0 : i32, i32, i32
  }
  func.func @transform_1(%arg0: i32) -> (i32, i32, i32) {
    %c0_i32 = arith.constant 0 : i32
    %c0_i32_0 = arith.constant 0 : i32
    %c0_i32_1 = arith.constant 0 : i32
    return %arg0, %c0_i32, %c0_i32_0 : i32, i32, i32
  }
  func.func @transform_2(%arg0: i32) -> (i32, i32, i32) {
    %c0_i32 = arith.constant 0 : i32
    %c0_i32_0 = arith.constant 0 : i32
    %c0_i32_1 = arith.constant 0 : i32
    %c0_i32_2 = arith.constant 0 : i32
    return %c0_i32, %c0_i32_0, %c0_i32_1 : i32, i32, i32
  }
  func.func @transform_3(%arg0: i32) -> (i32, i32) {
    %c0_i32 = arith.constant 0 : i32
    %c0_i32_0 = arith.constant 0 : i32
    %c0_i32_1 = arith.constant 0 : i32
    return %c0_i32, %c0_i32_0 : i32, i32
  }
  func.func @transform_4(%arg0: i32) -> (i32, i32, i32) {
    %c0_i32 = arith.constant 0 : i32
    %c0_i32_0 = arith.constant 0 : i32
    %c0_i32_1 = arith.constant 0 : i32
    return %arg0, %c0_i32, %c0_i32_0 : i32, i32, i32
  }
}

module attributes {stable_mosaic.version = 11 : i64} {
  func.func @_conv_stride2_kernel(%arg0: i32, %arg1: memref<1x4x128xbf16, #tpu.memory_space<vmem>>, %arg2: memref<1x4x128xbf16, #tpu.memory_space<vmem>>, %arg3: memref<5x128x256xbf16, #tpu.memory_space<vmem>>, %arg4: memref<1x256xf32, #tpu.memory_space<vmem>>, %arg5: memref<1x2x256xf32, #tpu.memory_space<vmem>>) attributes {dimension_semantics = [#tpu.dimension_semantics<parallel>], iteration_bounds = array<i64: 2>, scalar_prefetch = 0 : i64, scratch_operands = 0 : i64, tpu.core_type = #tpu.core_type<tc>, window_params = [{transform_indices = @transform_0, window_bounds = array<i64: 1, 4, 128>}, {transform_indices = @transform_1, window_bounds = array<i64: 1, 4, 128>}, {pipeline_mode = #tpu.pipeline_mode<synchronous>, transform_indices = @transform_2, window_bounds = array<i64: 5, 128, 256>}, {pipeline_mode = #tpu.pipeline_mode<synchronous>, transform_indices = @transform_3, window_bounds = array<i64: 1, 256>}, {transform_indices = @transform_4, window_bounds = array<i64: 1, 2, 256>}]} {
    %cst = arith.constant 0.000000e+00 : f32
    %0 = vector.broadcast %cst : f32 to vector<2x256xf32>
    %c0 = arith.constant 0 : index
    %c0_0 = arith.constant 0 : index
    %c0_1 = arith.constant 0 : index
    %1 = vector.load %arg1[%c0, %c0_0, %c0_1] : memref<1x4x128xbf16, #tpu.memory_space<vmem>>, vector<1x2x128xbf16>
    %2 = vector.shape_cast %1 : vector<1x2x128xbf16> to vector<2x128xbf16>
    %c0_2 = arith.constant 0 : index
    %c0_3 = arith.constant 0 : index
    %c0_4 = arith.constant 0 : index
    %3 = vector.load %arg3[%c0_2, %c0_3, %c0_4] : memref<5x128x256xbf16, #tpu.memory_space<vmem>>, vector<1x128x256xbf16>
    %4 = vector.shape_cast %3 : vector<1x128x256xbf16> to vector<128x256xbf16>
    %cst_5 = arith.constant dense<0.000000e+00> : vector<2x256xf32>
    %5 = tpu.matmul %2, %4, %cst_5 {dimension_numbers = #tpu.dot_dimension_numbers<[1], [0], [0], [1], [0, 0, 1, 1], [], []>} : vector<2x128xbf16>, vector<128x256xbf16>, vector<2x256xf32> -> vector<2x256xf32>
    %6 = arith.addf %0, %5 : vector<2x256xf32>
    %c0_6 = arith.constant 0 : index
    %c0_7 = arith.constant 0 : index
    %c0_8 = arith.constant 0 : index
    %7 = vector.load %arg2[%c0_6, %c0_7, %c0_8] : memref<1x4x128xbf16, #tpu.memory_space<vmem>>, vector<1x2x128xbf16>
    %8 = vector.shape_cast %7 : vector<1x2x128xbf16> to vector<2x128xbf16>
    %c1 = arith.constant 1 : index
    %c0_9 = arith.constant 0 : index
    %c0_10 = arith.constant 0 : index
    %9 = vector.load %arg3[%c1, %c0_9, %c0_10] : memref<5x128x256xbf16, #tpu.memory_space<vmem>>, vector<1x128x256xbf16>
    %10 = vector.shape_cast %9 : vector<1x128x256xbf16> to vector<128x256xbf16>
    %cst_11 = arith.constant dense<0.000000e+00> : vector<2x256xf32>
    %11 = tpu.matmul %8, %10, %cst_11 {dimension_numbers = #tpu.dot_dimension_numbers<[1], [0], [0], [1], [0, 0, 1, 1], [], []>} : vector<2x128xbf16>, vector<128x256xbf16>, vector<2x256xf32> -> vector<2x256xf32>
    %12 = arith.addf %6, %11 : vector<2x256xf32>
    %c0_12 = arith.constant 0 : index
    %c1_13 = arith.constant 1 : index
    %c0_14 = arith.constant 0 : index
    %13 = vector.load %arg1[%c0_12, %c1_13, %c0_14] : memref<1x4x128xbf16, #tpu.memory_space<vmem>>, vector<1x2x128xbf16>
    %14 = vector.shape_cast %13 : vector<1x2x128xbf16> to vector<2x128xbf16>
    %c2 = arith.constant 2 : index
    %c0_15 = arith.constant 0 : index
    %c0_16 = arith.constant 0 : index
    %15 = vector.load %arg3[%c2, %c0_15, %c0_16] : memref<5x128x256xbf16, #tpu.memory_space<vmem>>, vector<1x128x256xbf16>
    %16 = vector.shape_cast %15 : vector<1x128x256xbf16> to vector<128x256xbf16>
    %cst_17 = arith.constant dense<0.000000e+00> : vector<2x256xf32>
    %17 = tpu.matmul %14, %16, %cst_17 {dimension_numbers = #tpu.dot_dimension_numbers<[1], [0], [0], [1], [0, 0, 1, 1], [], []>} : vector<2x128xbf16>, vector<128x256xbf16>, vector<2x256xf32> -> vector<2x256xf32>
    %18 = arith.addf %12, %17 : vector<2x256xf32>
    %c0_18 = arith.constant 0 : index
    %c1_19 = arith.constant 1 : index
    %c0_20 = arith.constant 0 : index
    %19 = vector.load %arg2[%c0_18, %c1_19, %c0_20] : memref<1x4x128xbf16, #tpu.memory_space<vmem>>, vector<1x2x128xbf16>
    %20 = vector.shape_cast %19 : vector<1x2x128xbf16> to vector<2x128xbf16>
    %c3 = arith.constant 3 : index
    %c0_21 = arith.constant 0 : index
    %c0_22 = arith.constant 0 : index
    %21 = vector.load %arg3[%c3, %c0_21, %c0_22] : memref<5x128x256xbf16, #tpu.memory_space<vmem>>, vector<1x128x256xbf16>
    %22 = vector.shape_cast %21 : vector<1x128x256xbf16> to vector<128x256xbf16>
    %cst_23 = arith.constant dense<0.000000e+00> : vector<2x256xf32>
    %23 = tpu.matmul %20, %22, %cst_23 {dimension_numbers = #tpu.dot_dimension_numbers<[1], [0], [0], [1], [0, 0, 1, 1], [], []>} : vector<2x128xbf16>, vector<128x256xbf16>, vector<2x256xf32> -> vector<2x256xf32>
    %24 = arith.addf %18, %23 : vector<2x256xf32>
    %c0_24 = arith.constant 0 : index
    %c2_25 = arith.constant 2 : index
    %c0_26 = arith.constant 0 : index
    %25 = vector.load %arg1[%c0_24, %c2_25, %c0_26] : memref<1x4x128xbf16, #tpu.memory_space<vmem>>, vector<1x2x128xbf16>
    %26 = vector.shape_cast %25 : vector<1x2x128xbf16> to vector<2x128xbf16>
    %c4 = arith.constant 4 : index
    %c0_27 = arith.constant 0 : index
    %c0_28 = arith.constant 0 : index
    %27 = vector.load %arg3[%c4, %c0_27, %c0_28] : memref<5x128x256xbf16, #tpu.memory_space<vmem>>, vector<1x128x256xbf16>
    %28 = vector.shape_cast %27 : vector<1x128x256xbf16> to vector<128x256xbf16>
    %cst_29 = arith.constant dense<0.000000e+00> : vector<2x256xf32>
    %29 = tpu.matmul %26, %28, %cst_29 {dimension_numbers = #tpu.dot_dimension_numbers<[1], [0], [0], [1], [0, 0, 1, 1], [], []>} : vector<2x128xbf16>, vector<128x256xbf16>, vector<2x256xf32> -> vector<2x256xf32>
    %30 = arith.addf %24, %29 : vector<2x256xf32>
    %c0_30 = arith.constant 0 : index
    %c0_31 = arith.constant 0 : index
    %31 = vector.load %arg4[%c0_30, %c0_31] : memref<1x256xf32, #tpu.memory_space<vmem>>, vector<1x256xf32>
    %32 = vector.broadcast %31 : vector<1x256xf32> to vector<2x256xf32>
    %33 = arith.addf %30, %32 : vector<2x256xf32>
    %c0_32 = arith.constant 0 : index
    %c0_33 = arith.constant 0 : index
    %c0_34 = arith.constant 0 : index
    %34 = vector.load %arg5[%c0_32, %c0_33, %c0_34] : memref<1x2x256xf32, #tpu.memory_space<vmem>>, vector<1x2x256xf32>
    %35 = vector.shape_cast %34 : vector<1x2x256xf32> to vector<2x256xf32>
    %36 = vector.shape_cast %33 : vector<2x256xf32> to vector<1x2x256xf32>
    tpu.vector_store %arg5[%c0_32, %c0_33, %c0_34], %36 {strides = array<i32>} : memref<1x2x256xf32, #tpu.memory_space<vmem>>, vector<1x2x256xf32>,
    return
  }
  func.func @transform_0(%arg0: i32) -> (i32, i32, i32) {
    %c0_i32 = arith.constant 0 : i32
    %c0_i32_0 = arith.constant 0 : i32
    %c0_i32_1 = arith.constant 0 : i32
    return %arg0, %c0_i32, %c0_i32_0 : i32, i32, i32
  }
  func.func @transform_1(%arg0: i32) -> (i32, i32, i32) {
    %c0_i32 = arith.constant 0 : i32
    %c0_i32_0 = arith.constant 0 : i32
    %c0_i32_1 = arith.constant 0 : i32
    return %arg0, %c0_i32, %c0_i32_0 : i32, i32, i32
  }
  func.func @transform_2(%arg0: i32) -> (i32, i32, i32) {
    %c0_i32 = arith.constant 0 : i32
    %c0_i32_0 = arith.constant 0 : i32
    %c0_i32_1 = arith.constant 0 : i32
    %c0_i32_2 = arith.constant 0 : i32
    return %c0_i32, %c0_i32_0, %c0_i32_1 : i32, i32, i32
  }
  func.func @transform_3(%arg0: i32) -> (i32, i32) {
    %c0_i32 = arith.constant 0 : i32
    %c0_i32_0 = arith.constant 0 : i32
    %c0_i32_1 = arith.constant 0 : i32
    return %c0_i32, %c0_i32_0 : i32, i32
  }
  func.func @transform_4(%arg0: i32) -> (i32, i32, i32) {
    %c0_i32 = arith.constant 0 : i32
    %c0_i32_0 = arith.constant 0 : i32
    %c0_i32_1 = arith.constant 0 : i32
    return %arg0, %c0_i32, %c0_i32_0 : i32, i32, i32
  }
}

</mosaic_0001>

<bundles_post_ra>
// kernel: encoder_forward.3
= control target key start
LH: loop header
LB: loop body
LE: loop exit
PB: predicated region body
PF: predicated region fallthrough
CT: control target
= control target key end

     0   :  { %9 = vsyncpa [#allocation3], 0  ;;  %s682_s0 = inlined_call_operand.vmem [shape: f32[2,10,1], index: 0, kind: input, shape index: {}]   ;;  %s683_s1 = inlined_call_operand.vmem [shape: f32[2,10,1], index: 1, kind: input, shape index: {}]   ;;  %s684_s2 = inlined_call_operand.hbm [shape: f32[5,1,64], index: 2, kind: input, shape index: {}]   ;;  %s685_s3 = inlined_call_operand.hbm [shape: f32[1,64], index: 3, kind: input, shape index: {}]   ;;  %s686_s4 = inlined_call_operand.vmem [shape: bf16[2,8,64], index: 4, kind: output, shape index: {}]  }
   0x1   :  { %10 = vsyncpa [#allocation5], 0  ;;  %s581_s15 = smov 0  }
   0x2 LB: > { %s587_s16 = sadd.s32 4294967295, %s549_s15   ;;  %p423_p0 = scmp.ge.s32.totalorder %s549_s15, 1  ;;  %s549_s15 = sphi %s581_s15, %s16_s15  }
   0x3   : > { %p141_p1 = scmp.lt.s32.totalorder %s549_s15, 3  ;;  %s551_s17 = smov [#allocation2]  }
   0x4   : > { %s153_s18 = sshll.u32 %s551_s17, 4  ;;  %p687_p3 = scmp.eq.s32.totalorder %s587_s16, 0  ;;  %s154_s18 = int_to_ptr.vmem [resolvable:$true] %s153_s18 }
   0x5   : > { %p591_p2 = pnand %p423_p0, %p141_p1  ;;  %s552_s20 = smov [#allocation4]  }
   0x6   : > { %s167_s21 = sshll.u32 %s552_s20, 4  ;;  %s479_s25 = scalar_lea.hbm %s684_s2, 80  ;;  %s604_s21 = int_to_ptr.vmem [resolvable:$true] %s167_s21 }
   0x7   : > { %s689_s19 = scalar_select %p591_p2, 1, 0 }
   0x8   : > { %p453_p4 = pneg %p591_p2  ;;  %p480_p6 = scmp.ne.s32.totalorder %s684_s2, %s479_s25 }
   0x9   : > { %p486_p10 = scmp.lt.u32.totalorder %s479_s25, %s684_s2 }
   0xa   : > { %p600_p5 = pnand %p687_p3, %p453_p4 }
   0xc   : > { %p481_p7 = pneg %p600_p5 }
   0xe   : > { %p482_p8 = pnand %p481_p7, %p480_p6 }
  0x10   : > { %p483_p9 = pneg %p482_p8 }
  0x12   : > { %p488_p11 = pnand %p486_p10, %p483_p9 }
  0x14   : > { %491 = shalt.err (!%p488_p11)
}
  0x15   : > { %s492_s30 = scalar_lea.vmem %s154_s18, 80  ;;  %s499_s5 = scalar_lea.vmem %s154_s18, 96 }
  0x16   : > { %p493_p12 = scmp.ne.s32.totalorder %s154_s18, %s492_s30  ;;  %p500_p1 = scmp.lt.s32.totalorder %s154_s18, %s154_s18 }
  0x17   : > { %p501_p4 = scmp.lt.s32.totalorder %s499_s5, %s492_s30 }
  0x18   : > { %p495_p13 = pnand %p493_p12, %p481_p7 }
  0x19   : > { %p502_p3 = por %p501_p4, %p500_p1 }
  0x1a   : > { %p496_p0 = pneg %p495_p13 }
  0x1c   : > { %p503_p2 = pnand %p502_p3, %p496_p0 }
  0x1e   : > { %506 = shalt.err (!%p503_p2)
}
  0x1f   : > { %s553_s6 = smov 16   ;;  %s554_s7 = smov 1  }
  0x20   : > { %456 = dma.hbm_to_vmem [thread:$0]  (!%p600_p5), %s684_s2, 80, %s154_s18, [#allocation3], %s553_s6, %s553_s6, %s554_s7  }
  0x21   : > { %s507_s12 = scalar_lea.hbm %s685_s3, 16 }
  0x22   : > { %p508_p6 = scmp.ne.s32.totalorder %s685_s3, %s507_s12  ;;  %p514_p8 = scmp.lt.u32.totalorder %s507_s12, %s685_s3 }
  0x24   : > { %p510_p2 = pnand %p508_p6, %p481_p7 }
  0x26   : > { %p511_p3 = pneg %p510_p2 }
  0x28   : > { %p516_p9 = pnand %p514_p8, %p511_p3 }
  0x2a   : > { %519 = shalt.err (!%p516_p9)
}
  0x2b   : > { %s520_s18 = scalar_lea.vmem %s604_s21, 16  ;;  %s527_s23 = scalar_lea.vmem %s604_s21, 32 }
  0x2c   : > { %p521_p10 = scmp.ne.s32.totalorder %s604_s21, %s520_s18  ;;  %p528_p13 = scmp.lt.s32.totalorder %s604_s21, %s604_s21 }
  0x2d   : > { %p529_p0 = scmp.lt.s32.totalorder %s527_s23, %s520_s18 }
  0x2e   : > { %p523_p11 = pnand %p521_p10, %p481_p7 }
  0x2f   : > { %p530_p1 = por %p529_p0, %p528_p13 }
  0x30   : > { %p524_p12 = pneg %p523_p11 }
  0x32   : > { %p531_p4 = pnand %p530_p1, %p524_p12 }
  0x34   : > { %534 = shalt.err (!%p531_p4)
}
  0x35   : > { %459 = dma.hbm_to_vmem [thread:$0]  (!%p600_p5), %s685_s3, 16, %s604_s21, [#allocation5]  }
  0x36   : > { %p691_p6 = scmp.ne.s32.totalorder %s689_s19, 0 }
  0x37   : > { %p692_p7 = scmp.eq.s32.totalorder (!%p691_p6), %s587_s16, 0 }
  0x38   : > { %196 = sbr.rel (%p691_p6) target bundleno = 222 (0xde), region = 36 }
  0x3f   : > { %540 = dma.done.wait (%p692_p7), [#allocation3], 80   ;;  %p693_p2 = pmov %p692_p7 }
  0x41   : > { %542 = vsyncadd (%p693_p2), [#allocation3], 4294967216  ;;  %p694_p3 = pmov %p693_p2 }
  0x42   : > { %p695_p8 = pmov %p693_p2 }
  0x43   : > { %544 = dma.done.wait (%p694_p3), [#allocation5], 16  }
  0x44   : > { %546 = vsyncadd (%p695_p8), [#allocation5], 4294967280  ;;  %p230_p9 = scmp.lt.s32.totalorder %s587_s16, 1  ;;  %v555_v0 = vmov 0   ;;  %v435_v8 = vld [vmem:[#allocation2] ss:$0 sm:$0xff] }
  0x45   : > { %478 = vset.pattern.permute.xlu1 %v555_v0  ;;  %477 = vset.pattern.permute.xlu0 %v555_v0  ;;  %v436_v9 = vld [vmem:[#allocation2 + $0x1] ss:$0 sm:$0xff]  ;;  %v437_v10 = vld [vmem:[#allocation2 + $0x2] ss:$0 sm:$0xff]  ;;  %v438_v14 = vld [vmem:[#allocation2 + $0x3] ss:$0 sm:$0xff] }
  0x46   : > { %s697_s16 = smov (!%p230_p9, %s587_s16), 1  ;;  %v439_v18 = vld [vmem:[#allocation2 + $0x4] ss:$0 sm:$0xff]  ;;  %v440_v24 = vld [vmem:[#allocation4] ss:$0 sm:$0xff]  ;;  %vm332_vm0 = vcmask 519168  }
  0x47   : > { %s443_s19 = sshll.u32 %s697_s16, 4  ;;  %s434_s30 = sshll.u32 %s697_s16, 2 }
  0x48   : > { %s234_s26 = scalar_lea.vmem %s682_s0, %s443_s19  ;;  %s239_s29 = scalar_lea.vmem %s683_s1, %s443_s19 }
  0x49   : > { %v275_v1 = vld [vmem:[%s234_s26 + $0x1] sm:$0xff]  ;;  %s243_s7 = scalar_lea.vmem %s686_s4, %s434_s30 }
  0x4a   : > { %v244_v2 = vld [vmem:[%s234_s26] sm:$0xff]  ;;  %280 = vperm.xlu1 %478, %v275_v1  }
  0x4b   : > { %248 = vperm.xlu0 %477, %v244_v2   ;;  %v291_v3 = vld [vmem:[%s239_s29 + $0x1] sm:$0xff] }
  0x4c   : > { %v259_v4 = vld [vmem:[%s239_s29] sm:$0xff] }
  0x4d   : > { %v307_v5 = vld [vmem:[%s234_s26 + $0x2] sm:$0xff] }
  0x4e   : > { %296 = vperm.xlu1 %478, %v291_v3  }
  0x4f   : > { %264 = vperm.xlu0 %477, %v259_v4  }
  0x53   : > { %312 = vperm.xlu0 %477, %v307_v5  }
  0xc9   : > { %v281_v6 = vpop.permute.xlu1 %280 }
  0xca   : > { %v249_v7 = vpop.permute.xlu0 %248  ;;  %v289_v16 = vmul.f32 %v437_v10, %v281_v6 }
  0xcb   : > { %v257_v12 = vmul.f32 %v435_v8, %v249_v7 }
  0xcd   : > { %v297_v15 = vpop.permute.xlu1 %296 }
  0xce   : > { %v265_v11 = vpop.permute.xlu0 %264  ;;  %v305_v20 = vmul.f32 %v438_v14, %v297_v15 }
  0xcf   : > { %v273_v13 = vmul.f32 %v436_v9, %v265_v11 }
  0xd1   : > { %v274_v17 = vadd.f32 %v273_v13, %v257_v12 }
  0xd2   : > { %v313_v19 = vpop.permute.xlu0 %312 }
  0xd3   : > { %v290_v21 = vadd.f32 %v289_v16, %v274_v17  ;;  %v321_v23 = vmul.f32 %v439_v18, %v313_v19 }
  0xd5   : > { %v306_v22 = vadd.f32 %v305_v20, %v290_v21 }
  0xd7   : > { %v322_v25 = vadd.f32 %v321_v23, %v306_v22 }
  0xd9   : > { %v330_v26 = vadd.f32 %v440_v24, %v322_v25 }
  0xdb   : > { %v331_v27 = vpack.c.bf16 %v330_v26, %v330_v26 }
  0xdd   : > { %333 = vst.msk [vmem:[%s243_s7] sm:$0xf] %vm332_vm0, %v331_v27 }
  0xde PF: > { %s16_s15 = sadd.s32 1, %s549_s15  }
  0xdf   : > { %p13_p5 = scmp.ge.s32.totalorder %s16_s15, 4  }
  0xe1   :  { %15 = sbr.rel (!%p13_p5) target bundleno = 2 (0x2), region = 82 }
  0xe8   :  { %353 = vsyncpa [#allocation3], 1 }
  0xe9   :  { %355 = vsyncpa [#allocation3 + $0x1], 1 }
  0xea   :  { %356 = vsyncpa [#allocation5], 1 }

// kernel: encoder_forward.4
= control target key start
LH: loop header
LB: loop body
LE: loop exit
PB: predicated region body
PF: predicated region fallthrough
CT: control target
= control target key end

     0   :  { %s922_s15 = smov 0   ;;  %s1049_s0 = inlined_call_operand.vmem [shape: bf16[2,6,64], index: 0, kind: input, shape index: {}]   ;;  %s1050_s1 = inlined_call_operand.vmem [shape: bf16[2,6,64], index: 1, kind: input, shape index: {}]   ;;  %s1051_s2 = inlined_call_operand.vmem [shape: bf16[5,64,128], index: 2, kind: input, shape index: {}]   ;;  %s1052_s3 = inlined_call_operand.vmem [shape: f32[1,128], index: 3, kind: input, shape index: {}]   ;;  %s1053_s4 = inlined_call_operand.vmem [shape: bf16[2,4,128], index: 4, kind: output, shape index: {}]  }
   0x1 LB: > { %s698_s16 = sadd.s32 4294967295, %s893_s15   ;;  %p702_p0 = scmp.ge.s32.totalorder %s893_s15, 1  ;;  %s893_s15 = sphi %s922_s15, %s14_s15  }
   0x2   : > { %p170_p1 = scmp.lt.s32.totalorder %s893_s15, 3 }
   0x4   : > { %p171_p2 = pnand %p702_p0, %p170_p1 }
   0x5   : > { %v864_v0 = vld [vmem:[%s1051_s2 + $0x20] sm:$0xff] (!%p171_p2)   ;;  %v895_v1 = vmov (!%p171_p2), 0.0   ;;  %v866_v3 = vld [vmem:[%s1051_s2 + $0x28] sm:$0xff] (!%p171_p2)   ;;  %vm896_vm0 = vmmov (!%p171_p2), 0   ;;  %p198_p3 = scmp.lt.s32.totalorder (!%p171_p2), %s698_s16, 1  ;;  %v868_v5 = vld [vmem:[%s1051_s2 + $0x30] sm:$0xff] (!%p171_p2)  }
   0x6   : > { %174 = sbr.rel (%p171_p2) target bundleno = 273 (0x111), region = 36  ;;  %794 = vmatprep.subr.bf16.mxu0 (!%p171_p2), %v895_v1  ;;  %806 = vmatprep.subr.bf16.mxu1 (!%p171_p2), %v895_v1  ;;  %v865_v2 = vld [vmem:[%s1051_s2] sm:$0xff] (!%p171_p2)   ;;  %v867_v4 = vld [vmem:[%s1051_s2 + $0x8] sm:$0xff] (!%p171_p2)   ;;  %v869_v6 = vld [vmem:[%s1051_s2 + $0x10] sm:$0xff] (!%p171_p2)   ;;  %vm254_vm1 = vcmask (!%p171_p2), 523264  }
   0x7   : > { %795 = vmatpush3.bf16.msra.mxu0 (!%p171_p2), %v864_v0  ;;  %802 = vmatprep.mubr.msk.bf16.mxu0 (!%p171_p2), %vm896_vm0, %v895_v1  ;;  %v870_v7 = vld [vmem:[%s1051_s2 + $0x38] sm:$0xff] (!%p171_p2)   ;;  %v875_v11 = vld [vmem:[%s1051_s2 + $0x40] sm:$0xff] (!%p171_p2)   ;;  %v877_v15 = vld [vmem:[%s1051_s2 + $0x48] sm:$0xff] (!%p171_p2)  }
   0x8   : > { %807 = vmatpush3.bf16.msra.mxu1 (!%p171_p2), %v865_v2  ;;  %796 = vmatprep.subr.bf16.mxu0 (!%p171_p2), %v895_v1  ;;  %v871_v8 = vld [vmem:[%s1051_s2 + $0x18] sm:$0xff] (!%p171_p2)   ;;  %v876_v12 = vld [vmem:[%s1051_s2 + $0x60] sm:$0xff] (!%p171_p2)   ;;  %v878_v16 = vld [vmem:[%s1051_s2 + $0x68] sm:$0xff] (!%p171_p2)  }
   0x9   : > { %808 = vmatprep.subr.bf16.mxu1 (!%p171_p2), %v895_v1  ;;  %814 = vmatprep.mubr.msk.bf16.mxu1 (!%p171_p2), %vm896_vm0, %v895_v1  ;;  %v879_v19 = vld [vmem:[%s1051_s2 + $0x50] sm:$0xff] (!%p171_p2)   ;;  %v881_v25 = vld [vmem:[%s1051_s2 + $0x58] sm:$0xff] (!%p171_p2)   ;;  %v883_v29 = vld [vmem:[%s1051_s2 + $0x80] sm:$0xff] (!%p171_p2)  }
   0xa   : > { %v880_v20 = vld [vmem:[%s1051_s2 + $0x70] sm:$0xff] (!%p171_p2)   ;;  %v882_v26 = vld [vmem:[%s1051_s2 + $0x78] sm:$0xff] (!%p171_p2)   ;;  %v884_v30 = vld [vmem:[%s1051_s2 + $0x88] sm:$0xff] (!%p171_p2)  }
   0xb   : > { %797 = vmatpush3.bf16.msra.mxu0 (!%p171_p2), %v866_v3  ;;  %v885_v31 = vld [vmem:[%s1051_s2 + $0x90] sm:$0xff] (!%p171_p2)   ;;  %v886_v33 = vld [vmem:[%s1051_s2 + $0x98] sm:$0xff] (!%p171_p2)   ;;  %v766_v55 = vld [vmem:[%s1052_s3] ss:$0 sm:$0xff] (!%p171_p2) }
   0xc   : > { %809 = vmatpush3.bf16.msra.mxu1 (!%p171_p2), %v867_v4  ;;  %798 = vmatprep.subr.bf16.mxu0 (!%p171_p2), %v895_v1 }
   0xd   : > { %s1055_s16 = smov (!%p198_p3, %s698_s16), 1  ;;  %810 = vmatprep.subr.bf16.mxu1 %v895_v1 }
   0xe   : > { %s703_s27 = sshll.u32 %s1055_s16, 2  ;;  %s705_s18 = sshll.u32 %s1055_s16, 1 }
   0xf   : > { %s205_s6 = scalar_lea.vmem %s1050_s1, %s703_s27  ;;  %s967_s9 = scalar_lea.vmem %s1049_s0, %s703_s27  ;;  %799 = vmatpush3.bf16.msra.mxu0 %v868_v5 }
  0x10   : > { %811 = vmatpush3.bf16.msra.mxu1 %v869_v6  ;;  %800 = vmatprep.subr.bf16.mxu0 %v895_v1  ;;  %v220_v9 = vld [vmem:[%s205_s6] sm:$0x3]  ;;  %s209_s21 = scalar_lea.vmem %s1053_s4, %s705_s18 }
  0x11   : > { %812 = vmatprep.subr.bf16.mxu1 %v895_v1  ;;  %v211_v10 = vld [vmem:[%s967_s9] sm:$0x3] }
  0x12   : > { %v873_v13 = vld [vmem:[%s967_s9] ss:$0 sps:$4 sm:$0x77]  }
  0x13   : > { %801 = vmatpush3.bf16.msra.mxu0 %v870_v7  ;;  %v872_v14 = vld [vmem:[%s205_s6] ss:$0 sps:$4 sm:$0x77]   ;;  %v381_v17 = vshll.u32 %v873_v13, 16  ;;  %v379_v21 = vshrl.u32 %v873_v13, 16 }
  0x14   : > { %813 = vmatpush3.bf16.msra.mxu1 %v871_v8  ;;  %818 = vmatprep.subr.bf16.mxu0 %v895_v1  ;;  %v469_v18 = vshll.u32 %v872_v14, 16  ;;  %v467_v23 = vshrl.u32 %v872_v14, 16  ;;  %v874_v32 = vld [vmem:[%s967_s9] ss:$0 sps:$4 sm:$0x66]  }
  0x15   : > { %830 = vmatprep.subr.bf16.mxu1 %v895_v1  ;;  %v383_v22 = vrot.slane %v381_v17, 1  ;;  %v554_v34 = vrot.slane %v874_v32, 1 }
  0x16   : > { %803 = vmatmul.mubr.msk.bf16.vlgmr.msra.gmra.mrb[0].mxu0 %vm254_vm1, %v220_v9  ;;  %v471_v24 = vrot.slane %v469_v18, 1 }
  0x17   : > { %815 = vmatmul.mubr.msk.bf16.vlgmr.msra.gmra.mrb[0].mxu1 %vm254_vm1, %v211_v10  ;;  %819 = vmatpush3.bf16.msra.mxu0 %v875_v11  ;;  %v384_v27 = vor.u32 %v383_v22, %v379_v21 }
  0x18   : > { %831 = vmatpush3.bf16.msra.mxu1 %v876_v12  ;;  %820 = vmatprep.subr.bf16.mxu0 %v895_v1  ;;  %v472_v28 = vor.u32 %v471_v24, %v467_v23 }
  0x19   : > { %832 = vmatprep.subr.bf16.mxu1 %v895_v1  ;;  %826 = vmatprep.mubr.msk.bf16.mxu0 %vm896_vm0, %v895_v1 }
  0x1a   : > { %838 = vmatprep.mubr.msk.bf16.mxu1 %vm896_vm0, %v895_v1 }
  0x1b   : > { %821 = vmatpush3.bf16.msra.mxu0 %v877_v15 }
  0x1c   : > { %833 = vmatpush3.bf16.msra.mxu1 %v878_v16  ;;  %822 = vmatprep.subr.bf16.mxu0 %v895_v1 }
  0x1d   : > { %834 = vmatprep.subr.bf16.mxu1 %v895_v1 }
  0x1f   : > { %823 = vmatpush3.bf16.msra.mxu0 %v879_v19 }
  0x20   : > { %835 = vmatpush3.bf16.msra.mxu1 %v880_v20  ;;  %824 = vmatprep.subr.bf16.mxu0 %v895_v1 }
  0x21   : > { %836 = vmatprep.subr.bf16.mxu1 %v895_v1 }
  0x23   : > { %825 = vmatpush3.bf16.msra.mxu0 %v881_v25 }
  0x24   : > { %837 = vmatpush3.bf16.msra.mxu1 %v882_v26  ;;  %842 = vmatprep.subr.bf16.mxu0 %v895_v1 }
  0x26   : > { %827 = vmatmul.mubr.msk.bf16.vlgmr.msra.gmra.mrb[4].mxu0 %vm254_vm1, %v384_v27 }
  0x27   : > { %843 = vmatpush3.bf16.msra.mxu0 %v883_v29  ;;  %839 = vmatmul.mubr.msk.bf16.vlgmr.msra.gmra.mrb[4].mxu1 %vm254_vm1, %v472_v28 }
  0x28   : > { %844 = vmatprep.subr.bf16.mxu0 %v895_v1  ;;  %850 = vmatprep.mubr.msk.bf16.mxu0 %vm896_vm0, %v895_v1 }
  0x2b   : > { %845 = vmatpush3.bf16.msra.mxu0 %v884_v30 }
  0x2c   : > { %846 = vmatprep.subr.bf16.mxu0 %v895_v1 }
  0x2f   : > { %847 = vmatpush3.bf16.msra.mxu0 %v885_v31 }
  0x30   : > { %848 = vmatprep.subr.bf16.mxu0 %v895_v1 }
  0x33   : > { %849 = vmatpush3.bf16.msra.mxu0 %v886_v33 }
  0x36   : > { %851 = vmatmul.mubr.msk.bf16.vlgmr.msra.gmra.mrb[8].mxu0 %vm254_vm1, %v554_v34 }
  0xe9   : > { %v292_v35 = vpop.f32.mrb[0].mxu0 }
  0xea   : > { %v804_v36 = vpop.f32.mrb[1].mxu0  ;;  %v359_v37 = vpop.f32.mrb[0].mxu1 }
  0xeb   : > { %v360_v38 = vadd.f32 %v359_v37, %v292_v35  ;;  %v295_v39 = vpop.f32.mrb[2].mxu0  ;;  %v816_v40 = vpop.f32.mrb[1].mxu1 }
  0xec   : > { %v805_v41 = vpop.f32.mrb[3].mxu0  ;;  %v362_v42 = vpop.f32.mrb[2].mxu1 }
  0xed   : > { %v817_v43 = vpop.f32.mrb[3].mxu1 }
  0xf9   : > { %v446_v44 = vpop.f32.mrb[4].mxu0 }
  0xfa   : > { %v452_v45 = vadd.f32 %v446_v44, %v360_v38  ;;  %v828_v46 = vpop.f32.mrb[5].mxu0  ;;  %v534_v47 = vpop.f32.mrb[4].mxu1 }
  0xfb   : > { %v449_v48 = vpop.f32.mrb[6].mxu0  ;;  %v840_v49 = vpop.f32.mrb[5].mxu1 }
  0xfc   : > { %v540_v50 = vadd.f32 %v534_v47, %v452_v45  ;;  %v829_v51 = vpop.f32.mrb[7].mxu0  ;;  %v537_v52 = vpop.f32.mrb[6].mxu1 }
  0xfd   : > { %v841_v53 = vpop.f32.mrb[7].mxu1 }
 0x109   : > { %v616_v54 = vpop.f32.mrb[8].mxu0 }
 0x10a   : > { %v622_v56 = vadd.f32 %v616_v54, %v540_v50  ;;  %v852_v57 = vpop.f32.mrb[9].mxu0 }
 0x10b   : > { %v619_v58 = vpop.f32.mrb[10].mxu0 }
 0x10c   : > { %v630_v59 = vadd.f32 %v766_v55, %v622_v56  ;;  %v853_v60 = vpop.f32.mrb[11].mxu0 }
 0x10e   : > { %v631_v61 = vpack.c.bf16 %v630_v59, %v630_v59 }
 0x110   : > { %632 = vst [vmem:[%s209_s21] sm:$0x3] %v631_v61 }
 0x111 PF: > { %s14_s15 = sadd.s32 1, %s893_s15  }
 0x112   : > { %p11_p4 = scmp.ge.s32.totalorder %s14_s15, 4  }
 0x114   :  { %13 = sbr.rel (!%p11_p4) target bundleno = 1 (0x1), region = 73 }

// kernel: encoder_forward.5
= control target key start
LH: loop header
LB: loop body
LE: loop exit
PB: predicated region body
PF: predicated region fallthrough
CT: control target
= control target key end

     0   :  { %9 = vsyncpa [#allocation3], 0  ;;  %s1837_s0 = inlined_call_operand.vmem [shape: bf16[2,4,128], index: 0, kind: input, shape index: {}]   ;;  %s1838_s1 = inlined_call_operand.vmem [shape: bf16[2,4,128], index: 1, kind: input, shape index: {}]   ;;  %s1839_s2 = inlined_call_operand.vmem [shape: bf16[5,128,256], index: 2, kind: input, shape index: {}]   ;;  %s1840_s3 = inlined_call_operand.vmem [shape: f32[1,256], index: 3, kind: input, shape index: {}]   ;;  %s1841_s4 = inlined_call_operand.hbm [shape: f32[2,2,256], index: 4, kind: output, shape index: {}]  }
   0x1   :  { %11 = vsyncpa [#allocation3 + $0x1], 0  ;;  %s1477_s15 = smov 0   ;;  %s1479_s16 = smov 0  }
   0x2   :  { %s1481_s17 = smov 0   ;;  %s1483_s18 = smov 0  }
   0x3 LB: > { %s1498_s19 = sadd.s32 4294967295, %s1448_s18   ;;  %s1065_s20 = sadd.s32 4294967294, %s1448_s18   ;;  %s1448_s18 = sphi %s1483_s18, %s1847_s18   ;;  %s1444_s17 = sphi %s1481_s17, %s1846_s17   ;;  %s1440_s16 = sphi %s1479_s16, %s1845_s16   ;;  %s1436_s15 = sphi %s1477_s15, %s1844_s15  }
   0x4   : > { %s1502_s21 = sadd.s32 1, %s1448_s18   ;;  %s118_s22 = sadd.s32 1, %s1444_s17 }
   0x5   : > { %s115_s23 = ssub.s32 %s1448_s18, %s1502_s21  ;;  %p128_p0 = scmp.ne.s32.totalorder %s1444_s17, %s1440_s16 }
   0x6   : > { %p116_p1 = scmp.eq.s32.totalorder %s115_s23, 0  ;;  %p129_p2 = scmp.eq.s32.totalorder %s1498_s19, 1 }
   0x7   : > { %p134_p3 = scmp.ne.s32.totalorder %s1440_s16, %s1436_s15  ;;  %p135_p4 = scmp.eq.s32.totalorder %s1065_s20, 1 }
   0x8   : > { %s1513_s24 = scalar_select %p116_p1, %s1444_s17, %s118_s22  }
   0x9   : > { %p1515_p5 = por %p129_p2, %p128_p0  ;;  %p1519_p6 = por %p135_p4, %p134_p3 }
   0xa   : > { %p1068_p7 = scmp.ge.s32.totalorder %s1448_s18, 1  ;;  %p173_p8 = scmp.lt.s32.totalorder %s1448_s18, 3 }
   0xc   : > { %p174_p9 = pnand %p1068_p7, %p173_p8 }
   0xd   : > { %v1266_v0 = vld [vmem:[%s1839_s2 + $0x84] ss:$8 sps:$4 sm:$0xff] (!%p174_p9)   ;;  %v1450_v2 = vmov (!%p174_p9), 0   ;;  %v1270_v3 = vld [vmem:[%s1839_s2 + $0x80] ss:$8 sps:$4 sm:$0xff] (!%p174_p9)   ;;  %p202_p10 = scmp.lt.s32.totalorder (!%p174_p9), %s1498_s19, 1 }
   0xe   : > { %177 = sbr.rel (%p174_p9) target bundleno = 344 (0x158), region = 36  ;;  %v1268_v1 = vld [vmem:[%s1839_s2 + $0x4] ss:$8 sps:$4 sm:$0xff] (!%p174_p9)   ;;  %358 = vmatprep.mubr.bf16.mxu0 (!%p174_p9), %v1450_v2  ;;  %479 = vmatprep.mubr.bf16.mxu1 (!%p174_p9), %v1450_v2  ;;  %v1271_v4 = vld [vmem:[%s1839_s2] ss:$8 sps:$4 sm:$0xff] (!%p174_p9)  }
   0xf   : > { %326 = vmatprep.subr.bf16.mxu0 (!%p174_p9), %v1266_v0  ;;  %447 = vmatprep.subr.bf16.mxu1 (!%p174_p9), %v1268_v1  ;;  %v1272_v5 = vld [vmem:[%s1839_s2 + $0x94] ss:$8 sps:$4 sm:$0xff] (!%p174_p9)   ;;  %v1276_v7 = vld [vmem:[%s1839_s2 + $0x90] ss:$8 sps:$4 sm:$0xff] (!%p174_p9)   ;;  %v1278_v9 = vld [vmem:[%s1839_s2 + $0xa4] ss:$8 sps:$4 sm:$0xff] (!%p174_p9)  }
  0x10   : > { %327 = vmatpush1.bf16.msra.mxu0 (!%p174_p9), %v1270_v3  ;;  %448 = vmatpush1.bf16.msra.mxu1 (!%p174_p9), %v1271_v4  ;;  %v1274_v6 = vld [vmem:[%s1839_s2 + $0x14] ss:$8 sps:$4 sm:$0xff] (!%p174_p9)   ;;  %v1277_v8 = vld [vmem:[%s1839_s2 + $0x10] ss:$8 sps:$4 sm:$0xff] (!%p174_p9)   ;;  %v1280_v10 = vld [vmem:[%s1839_s2 + $0x24] ss:$8 sps:$4 sm:$0xff] (!%p174_p9)  }
  0x11   : > { %328 = vmatprep.subr.bf16.mxu0 (!%p174_p9), %v1272_v5  ;;  %449 = vmatprep.subr.bf16.mxu1 (!%p174_p9), %v1274_v6  ;;  %v1282_v11 = vld [vmem:[%s1839_s2 + $0xa0] ss:$8 sps:$4 sm:$0xff] (!%p174_p9)   ;;  %v1284_v13 = vld [vmem:[%s1839_s2 + $0xb4] ss:$8 sps:$4 sm:$0xff] (!%p174_p9)   ;;  %v1288_v15 = vld [vmem:[%s1839_s2 + $0xb0] ss:$8 sps:$4 sm:$0xff] (!%p174_p9)  }
  0x12   : > { %v1283_v12 = vld [vmem:[%s1839_s2 + $0x20] ss:$8 sps:$4 sm:$0xff] (!%p174_p9)   ;;  %v1286_v14 = vld [vmem:[%s1839_s2 + $0x34] ss:$8 sps:$4 sm:$0xff] (!%p174_p9)   ;;  %v1289_v16 = vld [vmem:[%s1839_s2 + $0x30] ss:$8 sps:$4 sm:$0xff] (!%p174_p9)  }
  0x13   : > { %v1290_v17 = vld [vmem:[%s1839_s2 + $0xc4] ss:$8 sps:$4 sm:$0xff] (!%p174_p9)   ;;  %v1294_v19 = vld [vmem:[%s1839_s2 + $0xc0] ss:$8 sps:$4 sm:$0xff] (!%p174_p9)   ;;  %v1296_v21 = vld [vmem:[%s1839_s2 + $0xd4] ss:$8 sps:$4 sm:$0xff] (!%p174_p9)  }
  0x14   : > { %329 = vmatpush1.bf16.msra.mxu0 (!%p174_p9), %v1276_v7  ;;  %450 = vmatpush1.bf16.msra.mxu1 (!%p174_p9), %v1277_v8  ;;  %v1292_v18 = vld [vmem:[%s1839_s2 + $0x44] ss:$8 sps:$4 sm:$0xff] (!%p174_p9)   ;;  %v1295_v20 = vld [vmem:[%s1839_s2 + $0x40] ss:$8 sps:$4 sm:$0xff] (!%p174_p9)   ;;  %v1298_v22 = vld [vmem:[%s1839_s2 + $0x54] ss:$8 sps:$4 sm:$0xff] (!%p174_p9)  }
  0x15   : > { %330 = vmatprep.subr.bf16.mxu0 %v1278_v9  ;;  %451 = vmatprep.subr.bf16.mxu1 %v1280_v10  ;;  %v1300_v23 = vld [vmem:[%s1839_s2 + $0xd0] ss:$8 sps:$4 sm:$0xff]   ;;  %s203_s20 = scalar_select %p202_p10, %s1498_s19, 1  ;;  %v1302_v25 = vld [vmem:[%s1839_s2 + $0xe4] ss:$8 sps:$4 sm:$0xff]  }
  0x16   : > { %v1301_v24 = vld [vmem:[%s1839_s2 + $0x50] ss:$8 sps:$4 sm:$0xff]   ;;  %v1304_v26 = vld [vmem:[%s1839_s2 + $0x64] ss:$8 sps:$4 sm:$0xff]   ;;  %v1306_v27 = vld [vmem:[%s1839_s2 + $0xe0] ss:$8 sps:$4 sm:$0xff]  }
  0x17   : > { %v1307_v28 = vld [vmem:[%s1839_s2 + $0x60] ss:$8 sps:$4 sm:$0xff]   ;;  %s1070_s7 = sshll.u32 %s203_s20, 1  ;;  %v1308_v29 = vld [vmem:[%s1839_s2 + $0xf4] ss:$8 sps:$4 sm:$0xff]  }
  0x18   : > { %331 = vmatpush1.bf16.msra.mxu0 %v1282_v11  ;;  %452 = vmatpush1.bf16.msra.mxu1 %v1283_v12  ;;  %v1310_v30 = vld [vmem:[%s1839_s2 + $0x74] ss:$8 sps:$4 sm:$0xff]   ;;  %s1622_s14 = scalar_lea.vmem %s1838_s1, %s1070_s7  ;;  %v1312_v31 = vld [vmem:[%s1839_s2 + $0xf0] ss:$8 sps:$4 sm:$0xff]   ;;  %s1633_s30 = scalar_lea.vmem %s1837_s0, %s1070_s7  ;;  %v1316_v33 = vld [vmem:[%s1839_s2 + $0x104] ss:$8 sps:$4 sm:$0xff]  }
  0x19   : > { %332 = vmatprep.subr.bf16.mxu0 %v1284_v13  ;;  %453 = vmatprep.subr.bf16.mxu1 %v1286_v14  ;;  %v1313_v32 = vld [vmem:[%s1839_s2 + $0x70] ss:$8 sps:$4 sm:$0xff]   ;;  %v1319_v34 = vld [vmem:[%s1839_s2 + $0x184] ss:$8 sps:$4 sm:$0xff]   ;;  %v228_v35 = vld [vmem:[%s1622_s14] sm:$0x1] }
  0x1a   : > { %v211_v36 = vld [vmem:[%s1633_s30] sm:$0x1]  ;;  %v1322_v39 = vld [vmem:[%s1839_s2 + $0x114] ss:$8 sps:$4 sm:$0xff]   ;;  %v1320_v41 = vld [vmem:[%s1839_s2 + $0x110] ss:$8 sps:$4 sm:$0xff]  }
  0x1b   : > { %v1314_v37 = vld [vmem:[%s1839_s2 + $0x100] ss:$8 sps:$4 sm:$0xff]   ;;  %v1325_v40 = vld [vmem:[%s1839_s2 + $0x194] ss:$8 sps:$4 sm:$0xff]   ;;  %v1323_v42 = vld [vmem:[%s1839_s2 + $0x190] ss:$8 sps:$4 sm:$0xff]  }
  0x1c   : > { %333 = vmatpush1.bf16.msra.mxu0 %v1288_v15  ;;  %454 = vmatpush1.bf16.msra.mxu1 %v1289_v16  ;;  %v1317_v38 = vld [vmem:[%s1839_s2 + $0x180] ss:$8 sps:$4 sm:$0xff]   ;;  %v1328_v43 = vld [vmem:[%s1839_s2 + $0x124] ss:$8 sps:$4 sm:$0xff]   ;;  %v1334_v47 = vld [vmem:[%s1839_s2 + $0x134] ss:$8 sps:$4 sm:$0xff]  }
  0x1d   : > { %334 = vmatprep.subr.bf16.mxu0 %v1290_v17  ;;  %455 = vmatprep.subr.bf16.mxu1 %v1292_v18  ;;  %v1331_v44 = vld [vmem:[%s1839_s2 + $0x1a4] ss:$8 sps:$4 sm:$0xff]   ;;  %v1326_v45 = vld [vmem:[%s1839_s2 + $0x120] ss:$8 sps:$4 sm:$0xff]   ;;  %v1337_v48 = vld [vmem:[%s1839_s2 + $0x1b4] ss:$8 sps:$4 sm:$0xff]  }
  0x1e   : > { %v1329_v46 = vld [vmem:[%s1839_s2 + $0x1a0] ss:$8 sps:$4 sm:$0xff]   ;;  %v1332_v49 = vld [vmem:[%s1839_s2 + $0x130] ss:$8 sps:$4 sm:$0xff]   ;;  %v1340_v51 = vld [vmem:[%s1839_s2 + $0x144] ss:$8 sps:$4 sm:$0xff]  }
  0x1f   : > { %v1335_v50 = vld [vmem:[%s1839_s2 + $0x1b0] ss:$8 sps:$4 sm:$0xff]   ;;  %v1343_v52 = vld [vmem:[%s1839_s2 + $0x1c4] ss:$8 sps:$4 sm:$0xff]   ;;  %v1338_v53 = vld [vmem:[%s1839_s2 + $0x140] ss:$8 sps:$4 sm:$0xff]  }
  0x20   : > { %335 = vmatpush1.bf16.msra.mxu0 %v1294_v19  ;;  %456 = vmatpush1.bf16.msra.mxu1 %v1295_v20  ;;  %v1341_v54 = vld [vmem:[%s1839_s2 + $0x1c0] ss:$8 sps:$4 sm:$0xff]   ;;  %v1346_v55 = vld [vmem:[%s1839_s2 + $0x154] ss:$8 sps:$4 sm:$0xff]   ;;  %v1344_v59 = vld [vmem:[%s1839_s2 + $0x150] ss:$8 sps:$4 sm:$0xff]  }
  0x21   : > { %336 = vmatprep.subr.bf16.mxu0 %v1296_v21  ;;  %457 = vmatprep.subr.bf16.mxu1 %v1298_v22  ;;  %v1349_v56 = vld [vmem:[%s1839_s2 + $0x1d4] ss:$8 sps:$4 sm:$0xff]   ;;  %v1169_v57 = vld.sshfl [vmem:[%s1622_s14] sm:$0x3 pattern:$0x76325410] }
  0x22   : > { %v1136_v58 = vld.sshfl [vmem:[%s1633_s30] sm:$0x3 pattern:$0x76325410]  ;;  %v1347_v60 = vld [vmem:[%s1839_s2 + $0x1d0] ss:$8 sps:$4 sm:$0xff]  }
  0x23   : > { %v1352_v61 = vld [vmem:[%s1839_s2 + $0x164] ss:$8 sps:$4 sm:$0xff]   ;;  %v674_v63 = vshll.u32 %v1169_v57, 16  ;;  %v517_v0 = vshll.u32 %v1136_v58, 16  ;;  %v1350_v1 = vld [vmem:[%s1839_s2 + $0x160] ss:$8 sps:$4 sm:$0xff]  }
  0x24   : > { %337 = vmatpush1.bf16.msra.mxu0 %v1300_v23  ;;  %458 = vmatpush1.bf16.msra.mxu1 %v1301_v24  ;;  %v1355_v62 = vld [vmem:[%s1839_s2 + $0x1e4] ss:$8 sps:$4 sm:$0xff]   ;;  %v1353_v3 = vld [vmem:[%s1839_s2 + $0x1e0] ss:$8 sps:$4 sm:$0xff]   ;;  %v1358_v4 = vld [vmem:[%s1839_s2 + $0x174] ss:$8 sps:$4 sm:$0xff]  }
  0x25   : > { %338 = vmatprep.subr.bf16.mxu0 %v1302_v25  ;;  %459 = vmatprep.subr.bf16.mxu1 %v1304_v26  ;;  %v1361_v5 = vld [vmem:[%s1839_s2 + $0x1f4] ss:$8 sps:$4 sm:$0xff]   ;;  %v672_v6 = vshrl.u32 %v1169_v57, 16  ;;  %v676_v7 = vrot.slane %v674_v63, 1  ;;  %v515_v8 = vshrl.u32 %v1136_v58, 16  ;;  %v519_v9 = vrot.slane %v517_v0, 1 }
  0x26   : > { %v1356_v10 = vld [vmem:[%s1839_s2 + $0x170] ss:$8 sps:$4 sm:$0xff]   ;;  %v1364_v12 = vld [vmem:[%s1839_s2 + $0x204] ss:$8 sps:$4 sm:$0xff]   ;;  %v1362_v15 = vld [vmem:[%s1839_s2 + $0x200] ss:$8 sps:$4 sm:$0xff]  }
  0x27   : > { %v1359_v11 = vld [vmem:[%s1839_s2 + $0x1f0] ss:$8 sps:$4 sm:$0xff]   ;;  %v677_v13 = vor.u32 %v676_v7, %v672_v6  ;;  %v520_v14 = vor.u32 %v519_v9, %v515_v8  ;;  %v1367_v16 = vld [vmem:[%s1839_s2 + $0x214] ss:$8 sps:$4 sm:$0xff]   ;;  %v1370_v18 = vld [vmem:[%s1839_s2 + $0x224] ss:$8 sps:$4 sm:$0xff]  }
  0x28   : > { %339 = vmatpush1.bf16.msra.mxu0 %v1306_v27  ;;  %460 = vmatpush1.bf16.msra.mxu1 %v1307_v28  ;;  %v1365_v17 = vld [vmem:[%s1839_s2 + $0x210] ss:$8 sps:$4 sm:$0xff]   ;;  %v1368_v19 = vld [vmem:[%s1839_s2 + $0x220] ss:$8 sps:$4 sm:$0xff]   ;;  %v1373_v20 = vld [vmem:[%s1839_s2 + $0x234] ss:$8 sps:$4 sm:$0xff]  }
  0x29   : > { %340 = vmatprep.subr.bf16.mxu0 %v1308_v29  ;;  %461 = vmatprep.subr.bf16.mxu1 %v1310_v30  ;;  %v1376_v21 = vld [vmem:[%s1839_s2 + $0x244] ss:$8 sps:$4 sm:$0xff]   ;;  %v1374_v22 = vld [vmem:[%s1839_s2 + $0x240] ss:$8 sps:$4 sm:$0xff]   ;;  %v1379_v23 = vld [vmem:[%s1839_s2 + $0x254] ss:$8 sps:$4 sm:$0xff]  }
  0x2a   : > { %v1377_v24 = vld [vmem:[%s1839_s2 + $0x250] ss:$8 sps:$4 sm:$0xff]   ;;  %v1382_v25 = vld [vmem:[%s1839_s2 + $0x264] ss:$8 sps:$4 sm:$0xff]   ;;  %v1380_v26 = vld [vmem:[%s1839_s2 + $0x260] ss:$8 sps:$4 sm:$0xff]  }
  0x2b   : > { %v1385_v27 = vld [vmem:[%s1839_s2 + $0x274] ss:$8 sps:$4 sm:$0xff]   ;;  %v1202_v28 = vld.sshfl [vmem:[%s1633_s30] sm:$0x2 pattern:$0x76325410] }
  0x2c   : > { %341 = vmatpush1.bf16.msra.mxu0 %v1312_v31  ;;  %462 = vmatpush1.bf16.msra.mxu1 %v1313_v32  ;;  %v1383_v29 = vld [vmem:[%s1839_s2 + $0x270] ss:$8 sps:$4 sm:$0xff]   ;;  %v828_v30 = vrot.slane %v1202_v28, 1  ;;  %s199_s30 = sand.u32 1, %s1440_s16   ;;  %s1225_s7 = sshll.u32 %s1498_s19, 6 }
  0x2d   : > { %602 = vmatprep.subr.bf16.mxu0 %v1316_v33  ;;  %759 = vmatprep.subr.bf16.mxu1 %v1319_v34  ;;  %s1069_s11 = sshll.u32 %s199_s30, 2  ;;  %s1795_s20 = scalar_lea.hbm %s1841_s4, %s1225_s7 }
  0x2e   : > { %s201_s14 = scalar_lea.vmem [#allocation2], %s1069_s11  ;;  %s980_s23 = scalar_lea.sflag [#allocation3], %s199_s30 }
  0x2f   : > { %359 = vmatmul.mubr.bf16.vlgmr.msra.gmra.mrb[0].mxu0 %v228_v35  ;;  %480 = vmatmul.mubr.bf16.vlgmr.msra.gmra.mrb[0].mxu1 %v211_v36  ;;  %s994_s12 = sshll.u32 %s201_s14, 4  ;;  %s1451_s19 = smov [#allocation2]   ;;  %s1797_s12 = int_to_ptr.vmem [resolvable:$true] %s994_s12 }
  0x30   : > { %603 = vmatpush1.bf16.msra.mxu0 %v1314_v37  ;;  %760 = vmatpush1.bf16.msra.mxu1 %v1317_v38  ;;  %s1386_s27 = scalar_lea.vmem %s1797_s12, 64  ;;  %s1390_s28 = sshll.u32 %s1451_s19, 4  ;;  %s1391_s28 = int_to_ptr.vmem [resolvable:$false] %s1390_s28 }
  0x31   : > { %604 = vmatprep.subr.bf16.mxu0 %v1322_v39  ;;  %761 = vmatprep.subr.bf16.mxu1 %v1325_v40  ;;  %p1387_p11 = scmp.ne.s32.totalorder %s1797_s12, %s1386_s27  ;;  %s1392_s29 = scalar_lea.vmem %s1391_s28, 128 }
  0x32   : > { %634 = vmatprep.mubr.bf16.mxu0 %v1450_v2  ;;  %791 = vmatprep.mubr.bf16.mxu1 %v1450_v2  ;;  %p1393_p0 = scmp.lt.s32.totalorder %s1797_s12, %s1391_s28  ;;  %p1394_p1 = scmp.lt.s32.totalorder %s1392_s29, %s1386_s27 }
  0x33   : > { %p1388_p12 = pnand %p1387_p11, %p1515_p5 }
  0x34   : > { %605 = vmatpush1.bf16.msra.mxu0 %v1320_v41  ;;  %762 = vmatpush1.bf16.msra.mxu1 %v1323_v42  ;;  %p1395_p2 = por %p1394_p1, %p1393_p0 }
  0x35   : > { %606 = vmatprep.subr.bf16.mxu0 %v1328_v43  ;;  %763 = vmatprep.subr.bf16.mxu1 %v1331_v44  ;;  %p1389_p13 = pneg %p1388_p12 }
  0x37   : > { %p1396_p3 = pnand %p1395_p2, %p1389_p13 }
  0x38   : > { %607 = vmatpush1.bf16.msra.mxu0 %v1326_v45  ;;  %764 = vmatpush1.bf16.msra.mxu1 %v1329_v46 }
  0x39   : > { %608 = vmatprep.subr.bf16.mxu0 %v1334_v47  ;;  %765 = vmatprep.subr.bf16.mxu1 %v1337_v48 }
  0x3c   : > { %609 = vmatpush1.bf16.msra.mxu0 %v1332_v49  ;;  %766 = vmatpush1.bf16.msra.mxu1 %v1335_v50 }
  0x3d   : > { %610 = vmatprep.subr.bf16.mxu0 %v1340_v51  ;;  %767 = vmatprep.subr.bf16.mxu1 %v1343_v52 }
  0x40   : > { %611 = vmatpush1.bf16.msra.mxu0 %v1338_v53  ;;  %768 = vmatpush1.bf16.msra.mxu1 %v1341_v54  ;;  %v955_v53 = vlaneseq }
  0x41   : > { %612 = vmatprep.subr.bf16.mxu0 %v1346_v55  ;;  %769 = vmatprep.subr.bf16.mxu1 %v1349_v56  ;;  %v953_v56 = vld [vmem:[%s1840_s3] sm:$0x3] }
  0x42   : > { %v956_v54 = vshrl.u32 %v955_v53, 7 }
  0x44   : > { %613 = vmatpush1.bf16.msra.mxu0 %v1344_v59  ;;  %770 = vmatpush1.bf16.msra.mxu1 %v1347_v60  ;;  %v957_v55 = vsub.s32 0, %v956_v54  ;;  %v961_v57 = vsub.s32 1, %v956_v54 }
  0x45   : > { %614 = vmatprep.subr.bf16.mxu0 %v1352_v61  ;;  %771 = vmatprep.subr.bf16.mxu1 %v1355_v62 }
  0x46   : > { %v958_v58 = vrot.slane %v953_v56, %v957_v55  ;;  %v962_v60 = vrot.slane %v953_v56, %v961_v57 }
  0x48   : > { %615 = vmatpush1.bf16.msra.mxu0 %v1350_v1  ;;  %772 = vmatpush1.bf16.msra.mxu1 %v1353_v3 }
  0x49   : > { %616 = vmatprep.subr.bf16.mxu0 %v1358_v4  ;;  %773 = vmatprep.subr.bf16.mxu1 %v1361_v5 }
  0x4c   : > { %617 = vmatpush1.bf16.msra.mxu0 %v1356_v10  ;;  %774 = vmatpush1.bf16.msra.mxu1 %v1359_v11 }
  0x4d   : > { %910 = vmatprep.subr.bf16.mxu0 %v1364_v12 }
  0x4f   : > { %635 = vmatmul.mubr.bf16.vlgmr.msra.gmra.mrb[4].mxu0 %v520_v14  ;;  %792 = vmatmul.mubr.bf16.vlgmr.msra.gmra.mrb[4].mxu1 %v677_v13 }
  0x50   : > { %911 = vmatpush1.bf16.msra.mxu0 %v1362_v15  ;;  %942 = vmatprep.mubr.bf16.mxu0 %v1450_v2  ;;  %v1371_v2 = vld [vmem:[%s1839_s2 + $0x230] ss:$8 sps:$4 sm:$0xff]  }
  0x51   : > { %912 = vmatprep.subr.bf16.mxu0 %v1367_v16 }
  0x54   : > { %913 = vmatpush1.bf16.msra.mxu0 %v1365_v17 }
  0x55   : > { %914 = vmatprep.subr.bf16.mxu0 %v1370_v18 }
  0x58   : > { %915 = vmatpush1.bf16.msra.mxu0 %v1368_v19 }
  0x59   : > { %916 = vmatprep.subr.bf16.mxu0 %v1373_v20 }
  0x5c   : > { %917 = vmatpush1.bf16.msra.mxu0 %v1371_v2 }
  0x5d   : > { %918 = vmatprep.subr.bf16.mxu0 %v1376_v21 }
  0x60   : > { %919 = vmatpush1.bf16.msra.mxu0 %v1374_v22 }
  0x61   : > { %920 = vmatprep.subr.bf16.mxu0 %v1379_v23 }
  0x64   : > { %921 = vmatpush1.bf16.msra.mxu0 %v1377_v24 }
  0x65   : > { %922 = vmatprep.subr.bf16.mxu0 %v1382_v25 }
  0x68   : > { %923 = vmatpush1.bf16.msra.mxu0 %v1380_v26 }
  0x69   : > { %924 = vmatprep.subr.bf16.mxu0 %v1385_v27 }
  0x6c   : > { %925 = vmatpush1.bf16.msra.mxu0 %v1383_v29 }
  0x6f   : > { %943 = vmatmul.mubr.bf16.vlgmr.msra.gmra.mrb[8].mxu0 %v828_v30 }
 0x102   : > { %v360_v31 = vpop.f32.mrb[0].mxu0  ;;  %v481_v32 = vpop.f32.mrb[0].mxu1 }
 0x103   : > { %v482_v33 = vadd.f32 %v481_v32, %v360_v31  ;;  %v362_v34 = vpop.f32.mrb[1].mxu0  ;;  %v483_v35 = vpop.f32.mrb[1].mxu1 }
 0x104   : > { %v484_v36 = vadd.f32 %v483_v35, %v362_v34  ;;  %v364_v37 = vpop.f32.mrb[2].mxu0  ;;  %v485_v38 = vpop.f32.mrb[2].mxu1 }
 0x105   : > { %v365_v39 = vpop.f32.mrb[3].mxu0  ;;  %v486_v40 = vpop.f32.mrb[3].mxu1 }
 0x122   : > { %v636_v41 = vpop.f32.mrb[4].mxu0  ;;  %v793_v42 = vpop.f32.mrb[4].mxu1 }
 0x123   : > { %v643_v43 = vadd.f32 %v636_v41, %v482_v33  ;;  %v638_v44 = vpop.f32.mrb[5].mxu0  ;;  %v795_v45 = vpop.f32.mrb[5].mxu1 }
 0x124   : > { %v644_v46 = vadd.f32 %v638_v44, %v484_v36  ;;  %v640_v47 = vpop.f32.mrb[6].mxu0  ;;  %v797_v48 = vpop.f32.mrb[6].mxu1 }
 0x125   : > { %v800_v49 = vadd.f32 %v793_v42, %v643_v43  ;;  %v641_v50 = vpop.f32.mrb[7].mxu0  ;;  %v798_v51 = vpop.f32.mrb[7].mxu1 }
 0x126   : > { %v801_v52 = vadd.f32 %v795_v45, %v644_v46 }
 0x142   : > { %v944_v59 = vpop.f32.mrb[8].mxu0 }
 0x143   : > { %v951_v61 = vadd.f32 %v944_v59, %v800_v49  ;;  %v946_v62 = vpop.f32.mrb[9].mxu0 }
 0x144   : > { %v952_v63 = vadd.f32 %v946_v62, %v801_v52  ;;  %v948_v0 = vpop.f32.mrb[10].mxu0 }
 0x145   : > { %v965_v1 = vadd.f32 %v958_v58, %v951_v61  ;;  %v949_v3 = vpop.f32.mrb[11].mxu0 }
 0x146   : > { %v966_v4 = vadd.f32 %v962_v60, %v952_v63 }
 0x148   : > { %v969_v5 = vcombine.low %v965_v1, %v966_v4 }
 0x14a   : > { %1219 = vst.sshfl [vmem:[%s201_s14] sm:$0x33 pattern:$0x76325410] %v969_v5 }
 0x14b   : > { %1399 = shalt.err (!%p1396_p3)
}
 0x14c   : > { %s1400_s5 = scalar_lea.hbm %s1795_s20, 64  ;;  %s1404_s30 = scalar_lea.hbm %s1841_s4, 128 }
 0x14d   : > { %p1401_p4 = scmp.ne.s32.totalorder %s1795_s20, %s1400_s5  ;;  %p1405_p9 = scmp.lt.u32.totalorder %s1795_s20, %s1841_s4 }
 0x14e   : > { %p1406_p10 = scmp.lt.u32.totalorder %s1404_s30, %s1400_s5  ;;  %p1408_p12 = scmp.lt.u32.totalorder %s1400_s5, %s1795_s20 }
 0x14f   : > { %p1402_p7 = pnand %p1401_p4, %p1515_p5 }
 0x150   : > { %p1407_p11 = por %p1406_p10, %p1405_p9 }
 0x151   : > { %p1403_p8 = pneg %p1402_p7 }
 0x152   : > { %p1409_p13 = por %p1408_p12, %p1407_p11 }
 0x154   : > { %p1410_p0 = pnand %p1409_p13, %p1403_p8 }
 0x156   : > { %1413 = shalt.err (!%p1410_p0)
}
 0x157   : > { %1226 = dma.vmem_to_hbm [thread:$0]  (%p1515_p5), %s1797_s12, 64, %s1795_s20, %s980_s23  }
 0x158 PF: > { %p1232_p1 = scmp.ge.s32.totalorder %s1448_s18, 2  ;;  %s1006_s11 = sand.u32 1, %s1436_s15  }
 0x159   : > { %s1007_s7 = scalar_lea.sflag [#allocation3], %s1006_s11 }
 0x15a   : > { %p1229_p2 = pnand %p1232_p1, %p1519_p6 }
 0x15c   : > { %1431 = dma.done.wait (!%p1229_p2), %s1007_s7, 64  }
 0x15d   : > { %1433 = vsyncadd (!%p1229_p2), %s1007_s7, 4294967232  ;;  %p14_p3 = scmp.ge.s32.totalorder %s1502_s21, 4   ;;  %s1844_s15 = smov %s1440_s16 }
 0x15e   : > { %s1845_s16 = smov %s1444_s17  ;;  %s1846_s17 = smov %s1513_s24 }
 0x15f   : > { %s1847_s18 = smov %s1502_s21  ;;  %16 = sbr.rel (!%p14_p3) target bundleno = 3 (0x3), region = 78 }
 0x166   :  { %1012 = vsyncpa [#allocation3], 1 }
 0x167   :  { %1014 = vsyncpa [#allocation3 + $0x1], 1 }

</bundles_post_ra>
